<compile_context>
chip_gen: v6e
topology: v6e:2x2x1
jax: 0.10.0
libtpu: 0.0.40
codegen_flags: <defaults>
</compile_context>

<pallas_src>
import jax
import jax.numpy as jnp
from jax.experimental import pallas as pl
from jax.experimental.pallas import tpu as pltpu


def _round_up(v, m):
    return ((v + m - 1) // m) * m


def lr_kernel(x_ref, w_ref, b_ref, o_ref, acc_ref):
    # x_ref: (tb, tk) VMEM tile, w_ref: (1, tk) VMEM tile,
    # b_ref: (1, 1) SMEM scalar, o_ref: (tb, 1) VMEM tile (resident across k),
    # acc_ref: (tb, 1) f32 VMEM scratch accumulator.
    k = pl.program_id(1)

    @pl.when(k == 0)
    def _init():
        acc_ref[...] = jnp.zeros_like(acc_ref)

    x = x_ref[...]            # native dtype
    w = w_ref[...]            # native dtype, broadcasts over rows
    prod = x * w              # VPU elementwise (bf16 VALU on v6e/v7x)

    tb, tk = prod.shape
    if prod.dtype == jnp.float32 or tk <= 128 or tk % 128 != 0:
        # f32 path (astype is a no-op) / tiny tk: single f32 lane reduce.
        partial = jnp.sum(prod.astype(jnp.float32), axis=-1, keepdims=True)
    else:
        # Sub-32-bit inputs: accumulate 128-lane chunks in f32 so the full
        # (tb, tk) product never has to live as f32 vregs, then one XLU reduce.
        chunk = prod[:, :128].astype(jnp.float32)
        for c in range(1, tk // 128):
            chunk = chunk + prod[:, c * 128:(c + 1) * 128].astype(jnp.float32)
        partial = jnp.sum(chunk, axis=-1, keepdims=True)

    acc_ref[...] += partial

    @pl.when(k == pl.num_programs(1) - 1)
    def _finalize():
        logits = acc_ref[...] + b_ref[0, 0]
        # sigmoid: exp and reciprocal both go to the (otherwise idle) EUP slot.
        out = pl.reciprocal(1.0 + jnp.exp(-logits), approx=False)
        o_ref[...] = out.astype(o_ref.dtype)


def lr_forward(x, w, b, *, max_block_bytes=8 * 1024 * 1024):
    """out = sigmoid(x @ w.T + b); x: (B, F), w: (1, F), b: (1, 1) -> (B, 1)."""
    B, F = x.shape
    w = jnp.asarray(w).reshape(1, F)
    b = jnp.asarray(b, dtype=jnp.float32).reshape(1, 1)
    itemsize = x.dtype.itemsize

    # --- lane-dense feature dim: pad F (and w) up to a multiple of 128 -------
    Fp = _round_up(F, 128)

    # --- feature tile tk: multiple of 128, divides Fp, fits the block budget -
    max_tk = max(128, (max_block_bytes // (8 * itemsize)) // 128 * 128)
    if Fp <= max_tk:
        tk = Fp
    else:
        tk = 128
        n_chunks = Fp // 128
        for d in range(n_chunks, 0, -1):          # largest divisor that fits
            if n_chunks % d == 0 and d * 128 <= max_tk:
                tk = d * 128
                break

    if Fp != F:
        # Zero padding keeps the dot product unchanged (padded w columns are 0).
        x = jnp.pad(x, ((0, 0), (0, Fp - F)))
        w = jnp.pad(w, ((0, 0), (0, Fp - F)))

    # --- batch tile tb: multiple of 8 rows, capped by the block budget -------
    tb = max(8, (max_block_bytes // (tk * itemsize)) // 8 * 8)
    tb = min(tb, _round_up(B, 8))

    num_b = pl.cdiv(B, tb)   # NO batch padding: partial last block is masked
    num_k = Fp // tk

    # --- explicit scoped-VMEM budget (raises v5e's 16 MiB default if needed,
    #     stays well under v7x's 64 MiB physical with the 8 MiB default block) -
    vmem_needed = (2 * tb * tk * itemsize            # x, double-buffered
                   + 2 * 8 * tk * w.dtype.itemsize   # w tile (8-sublane padded)
                   + 2 * tb * 128 * x.dtype.itemsize # out tile (128-lane padded)
                   + tb * 128 * 4)                   # f32 accumulator scratch
    vmem_limit = int(vmem_needed + (4 << 20))        # + headroom

    out = pl.pallas_call(
        lr_kernel,
        out_shape=jax.ShapeDtypeStruct((B, 1), x.dtype),
        grid_spec=pltpu.PrefetchScalarGridSpec(
            num_scalar_prefetch=0,
            grid=(num_b, num_k),                     # reduction axis last
            in_specs=[
                # x: tiled over (batch, feature) -> pipelined HBM streaming
                pl.BlockSpec((tb, tk), lambda i, k: (i, k)),
                # w: tiled over feature only (resident when num_k == 1)
                pl.BlockSpec((1, tk), lambda i, k: (0, k)),
                # b: scalar bias lives in SMEM
                pl.BlockSpec(memory_space=pltpu.MemorySpace.SMEM),
            ],
            # Same output block across k -> accumulator pattern; written once.
            out_specs=pl.BlockSpec((tb, 1), lambda i, k: (i, 0)),
            scratch_shapes=[pltpu.VMEM((tb, 1), jnp.float32)],
        ),
        compiler_params=pltpu.CompilerParams(
            # batch tiles independent -> megacore-shardable; F is a reduction.
            dimension_semantics=("parallel", "arbitrary"),
            vmem_limit_bytes=vmem_limit,
        ),
        cost_estimate=pl.CostEstimate(
            flops=2 * B * Fp,
            transcendentals=B,
            bytes_accessed=(B * Fp * itemsize + Fp * w.dtype.itemsize
                            + B * x.dtype.itemsize + 4),
        ),
    )(x, w, b)

    return out


if __name__ == "__main__":
    key = jax.random.PRNGKey(0)
    kx, kw, kb = jax.random.split(key, 3)

    def init_params(kw, kb, n_features):
        # Mimics torch.nn.Linear init: uniform(-1/sqrt(F), 1/sqrt(F))
        bound = 1.0 / jnp.sqrt(jnp.float32(n_features))
        w = jax.random.uniform(kw, (1, n_features), minval=-bound, maxval=bound,
                               dtype=jnp.float32)
        b = jax.random.uniform(kb, (1, 1), minval=-bound, maxval=bound,
                               dtype=jnp.float32)
        return w, b

    # Case 1: small canonical shape (batch=8, n_features=32).
    batch, n_features = 8, 32
    x = jax.random.normal(kx, (batch, n_features), dtype=jnp.float32)
    w, b = init_params(kw, kb, n_features)
    out = jax.block_until_ready(lr_forward(x, w, b))
    ref = jax.nn.sigmoid(x @ w.T + b)
    assert out.shape == (batch, 1)
    assert jnp.allclose(out, ref, atol=1e-5, rtol=1e-5)

    # Case 2: ragged batch (B % tb != 0) and non-128-multiple F -> exercises the
    # no-jnp.pad partial-last-block path and the lane-dense F padding.
    batch, n_features = 13, 200
    x2 = jax.random.normal(jax.random.fold_in(kx, 1), (batch, n_features),
                           dtype=jnp.float32)
    w2, b2 = init_params(jax.random.fold_in(kw, 1), jax.random.fold_in(kb, 1),
                         n_features)
    out2 = jax.block_until_ready(lr_forward(x2, w2, b2))
    ref2 = jax.nn.sigmoid(x2 @ w2.T + b2)
    assert out2.shape == (batch, 1)
    assert jnp.allclose(out2, ref2, atol=1e-5, rtol=1e-5)

    # Case 3: tiny block budget to force the F-tiled accumulator path
    # (multiple reduction steps over k) and multiple batch tiles.
    batch, n_features = 16, 512
    x3 = jax.random.normal(jax.random.fold_in(kx, 2), (batch, n_features),
                           dtype=jnp.float32)
    w3, b3 = init_params(jax.random.fold_in(kw, 2), jax.random.fold_in(kb, 2),
                         n_features)
    out3 = jax.block_until_ready(lr_forward(x3, w3, b3, max_block_bytes=8 * 1024))
    ref3 = jax.nn.sigmoid(x3 @ w3.T + b3)
    assert out3.shape == (batch, 1)
    assert jnp.allclose(out3, ref3, atol=1e-5, rtol=1e-5)

    print("KERNEL_OK")
</pallas_src>

<mosaic_0001>
module attributes {stable_mosaic.version = 11 : i64} {
  func.func @lr_kernel(%arg0: i32, %arg1: i32, %arg2: memref<8x128xf32, #tpu.memory_space<vmem>>, %arg3: memref<1x128xf32, #tpu.memory_space<vmem>>, %arg4: memref<1x1xf32, #tpu.memory_space<smem>>, %arg5: memref<8x1xf32, #tpu.memory_space<vmem>>, %arg6: memref<8x1xf32, #tpu.memory_space<vmem>>) attributes {dimension_semantics = [#tpu.dimension_semantics<parallel>, #tpu.dimension_semantics<arbitrary>], iteration_bounds = array<i64: 1, 1>, scalar_prefetch = 0 : i64, scratch_operands = 1 : i64, tpu.core_type = #tpu.core_type<tc>, window_params = [{transform_indices = @transform_0, window_bounds = array<i64: 8, 128>}, {transform_indices = @transform_1, window_bounds = array<i64: 1, 128>}, {transform_indices = @transform_2, window_bounds = array<i64: 1, 1>}, {transform_indices = @transform_3, window_bounds = array<i64: 8, 1>}]} {
    %c0_i32 = arith.constant 0 : i32
    %0 = arith.cmpi eq, %arg1, %c0_i32 : i32
    %1 = arith.extui %0 : i1 to i32
    %c0_i32_0 = arith.constant 0 : i32
    %2 = arith.cmpi ne, %1, %c0_i32_0 : i32
    scf.if %2 {
      %cst_10 = arith.constant 0.000000e+00 : f32
      %15 = vector.broadcast %cst_10 : f32 to vector<8x1xf32>
      %c0_11 = arith.constant 0 : index
      %c0_12 = arith.constant 0 : index
      %16 = vector.load %arg6[%c0_11, %c0_12] : memref<8x1xf32, #tpu.memory_space<vmem>>, vector<8x1xf32>
      tpu.vector_store %arg6[%c0_11, %c0_12], %15 {strides = array<i32>} : memref<8x1xf32, #tpu.memory_space<vmem>>, vector<8x1xf32>,
    } else {
    }
    %c0 = arith.constant 0 : index
    %c0_1 = arith.constant 0 : index
    %3 = vector.load %arg2[%c0, %c0_1] : memref<8x128xf32, #tpu.memory_space<vmem>>, vector<8x128xf32>
    %c0_2 = arith.constant 0 : index
    %c0_3 = arith.constant 0 : index
    %4 = vector.load %arg3[%c0_2, %c0_3] : memref<1x128xf32, #tpu.memory_space<vmem>>, vector<1x128xf32>
    %5 = vector.broadcast %4 : vector<1x128xf32> to vector<8x128xf32>
    %6 = arith.mulf %3, %5 : vector<8x128xf32>
    %cst = arith.constant dense<0.000000e+00> : vector<8xf32>
    %7 = vector.multi_reduction <add>, %6, %cst [1] : vector<8x128xf32> to vector<8xf32>
    %8 = vector.shape_cast %7 : vector<8xf32> to vector<8x1xf32>
    %c0_4 = arith.constant 0 : index
    %c0_5 = arith.constant 0 : index
    %9 = vector.load %arg6[%c0_4, %c0_5] : memref<8x1xf32, #tpu.memory_space<vmem>>, vector<8x1xf32>
    %10 = arith.addf %9, %8 : vector<8x1xf32>
    %c0_6 = arith.constant 0 : index
    %c0_7 = arith.constant 0 : index
    %11 = vector.load %arg6[%c0_6, %c0_7] : memref<8x1xf32, #tpu.memory_space<vmem>>, vector<8x1xf32>
    tpu.vector_store %arg6[%c0_6, %c0_7], %10 {strides = array<i32>} : memref<8x1xf32, #tpu.memory_space<vmem>>, vector<8x1xf32>,
    %c0_i32_8 = arith.constant 0 : i32
    %12 = arith.cmpi eq, %arg1, %c0_i32_8 : i32
    %13 = arith.extui %12 : i1 to i32
    %c0_i32_9 = arith.constant 0 : i32
    %14 = arith.cmpi ne, %13, %c0_i32_9 : i32
    scf.if %14 {
      %c0_10 = arith.constant 0 : index
      %c0_11 = arith.constant 0 : index
      %15 = vector.load %arg6[%c0_10, %c0_11] : memref<8x1xf32, #tpu.memory_space<vmem>>, vector<8x1xf32>
      %c0_12 = arith.constant 0 : index
      %c0_13 = arith.constant 0 : index
      %16 = memref.load %arg4[%c0_12, %c0_13] : memref<1x1xf32, #tpu.memory_space<smem>>
      %17 = vector.broadcast %16 : f32 to vector<8x1xf32>
      %18 = arith.addf %15, %17 : vector<8x1xf32>
      %cst_14 = arith.constant 0.000000e+00 : f32
      %19 = vector.broadcast %cst_14 : f32 to vector<8x1xf32>
      %20 = arith.subf %19, %18 : vector<8x1xf32>
      %21 = math.exp %20 : vector<8x1xf32>
      %cst_15 = arith.constant 1.000000e+00 : f32
      %22 = vector.broadcast %cst_15 : f32 to vector<8x1xf32>
      %23 = arith.addf %22, %21 : vector<8x1xf32>
      %24 = tpu.reciprocal %23 : vector<8x1xf32> -> vector<8x1xf32>
      %c0_16 = arith.constant 0 : index
      %c0_17 = arith.constant 0 : index
      %25 = vector.load %arg5[%c0_16, %c0_17] : memref<8x1xf32, #tpu.memory_space<vmem>>, vector<8x1xf32>
      tpu.vector_store %arg5[%c0_16, %c0_17], %24 {strides = array<i32>} : memref<8x1xf32, #tpu.memory_space<vmem>>, vector<8x1xf32>,
    } else {
    }
    return
  }
  func.func @transform_0(%arg0: i32, %arg1: i32) -> (i32, i32) {
    %c0_i32 = arith.constant 0 : i32
    return %arg0, %arg1 : i32, i32
  }
  func.func @transform_1(%arg0: i32, %arg1: i32) -> (i32, i32) {
    %c0_i32 = arith.constant 0 : i32
    %c0_i32_0 = arith.constant 0 : i32
    return %c0_i32, %arg1 : i32, i32
  }
  func.func @transform_2(%arg0: i32, %arg1: i32) -> (i32, i32) {
    %c0_i32 = arith.constant 0 : i32
    %c0_i32_0 = arith.constant 0 : i32
    %c0_i32_1 = arith.constant 0 : i32
    return %c0_i32, %c0_i32_0 : i32, i32
  }
  func.func @transform_3(%arg0: i32, %arg1: i32) -> (i32, i32) {
    %c0_i32 = arith.constant 0 : i32
    %c0_i32_0 = arith.constant 0 : i32
    return %arg0, %c0_i32 : i32, i32
  }
}

</mosaic_0001>

<bundles_post_ra>
// kernel: tpu_custom_call.1
= control target key start
LH: loop header
LB: loop body
LE: loop exit
PB: predicated region body
PF: predicated region fallthrough
CT: control target
= control target key end

     0   :  { %9 = vsyncpa [#allocation5], 0  ;;  %s95_s12 = smov [#allocation4]   ;;  %s132_s0 = inlined_call_operand.hbm [shape: f32[8,128], index: 0, kind: input, shape index: {}]   ;;  %s133_s1 = inlined_call_operand.vmem [shape: f32[1,128], index: 1, kind: input, shape index: {}]   ;;  %s134_s2 = inlined_call_operand.<no memory space> [shape: f32[1,1], index: 2, kind: input, shape index: {}]   ;;  %s135_s3 = inlined_call_operand.vmem [shape: f32[8,1], index: 3, kind: output, shape index: {}]  }
   0x1   :  { %s16_s13 = sshll.u32 %s95_s12, 4  ;;  %s17_s13 = int_to_ptr.vmem [resolvable:$true] %s16_s13 }
   0x2   :  { %s81_s14 = scalar_lea.vmem %s17_s13, 128  ;;  %p86_p1 = scmp.lt.s32.totalorder %s17_s13, %s17_s13 }
   0x3   :  { %p82_p0 = scmp.ne.s32.totalorder %s17_s13, %s81_s14  ;;  %p87_p2 = scmp.lt.s32.totalorder %s81_s14, %s81_s14 }
   0x5   :  { %p88_p3 = por %p87_p2, %p86_p1 }
   0x7   :  { %p89_p4 = pnand %p88_p3, %p82_p0 }
   0x9   :  { %92 = shalt.err (!%p89_p4)
}
   0xa   :  { %19 = dma.hbm_to_vmem [thread:$0]  %s132_s0, 128, %s17_s13, [#allocation5]  }
   0xb   :  { %93 = dma.done.wait [#allocation5], 128  }
   0xc   :  { %94 = vsyncadd [#allocation5], 4294967168  ;;  %vm31_vm0 = vcmask 7168   ;;  %v96_v0 = vmov 0.0   ;;  %v33_v1 = vld [vmem:[#allocation4] sm:$0xff]  ;;  %v53_v7 = vstv %s134_s2 }
   0xd   :  { %32 = vst.msk [vmem:[#allocation2] sm:$0xff] %vm31_vm0, %v96_v0  ;;  %v66_v2 = vld [vmem:[%s133_s1] ss:$0 sm:$0xff] }
   0xe   :  { %v41_v3 = vmul.f32 %v66_v2, %v33_v1 }
  0x10   :  { %42 = vadd.xlane.f32.xlu0 %v41_v3 }
  0x14   :  { %v44_v4 = vld [vmem:[#allocation2] sm:$0xff] }
  0x99   :  { %v43_v5 = vpop.xlane.xlu0 %42 }
  0x9a   :  { %v45_v6 = vadd.f32 %v44_v4, %v43_v5 }
  0x9c   :  { %47 = vst.msk [vmem:[#allocation2] sm:$0xff] %vm31_vm0, %v45_v6 }
  0xa3   :  { %v51_v8 = vld [vmem:[#allocation2] sm:$0xff] }
  0xa4   :  { %v54_v9 = vadd.f32 %v53_v7, %v51_v8 }
  0xa6   :  { %v55_v10 = vsub.f32 0.0, %v54_v9 }
  0xa8   :  { %v56_v11 = vmul.f32 1.442695, %v55_v10 }
  0xaa   :  { %69 = vpow2.f32 %v56_v11 }
  0xb7   :  { %v70_v12 = vpop.eup %69 }
  0xb8   :  { %v58_v13 = vadd.f32 1.0, %v70_v12 }
  0xba   :  { %71 = vrcp.f32 %v58_v13 }
  0xc7   :  { %v72_v14 = vpop.eup %71 }
  0xc8   :  { %60 = vst.msk [vmem:[%s135_s3] sm:$0xff] %vm31_vm0, %v72_v14 }
  0xc9   :  { %65 = vsyncpa [#allocation5], 1 }

</bundles_post_ra>
